<compile_context>
chip_gen: v7x
topology: tpu7x:2x2x1
jax: 0.10.0
libtpu: 0.0.40
codegen_flags: <defaults>
</compile_context>

<pallas_src>
import jax
import jax.numpy as jnp
from jax.experimental import pallas as pl
from jax.experimental.pallas import tpu as pltpu

# transposed conv (stride 1):
#   out[i, j, o] = b[o] + sum_{p,q,c} in[i + P - p, j + P - q, c] * w[c, o, p, q]
#   H_out = H_in + K - 1 - 2*P (+ output_padding, fed with zeros)
_K2, _P2 = 2, 3              # conv_2
_K3, _P3, _OP3 = 3, 2, 1     # conv_3
_KP = 2                      # avg_pool2d(kernel=2, stride=1) -- folded into conv_2
_KE2, _PE2 = _K2 + _KP - 1, _P2 + _KP - 1   # effective (pool o conv_2): K=3, pad=4


def _banded_weight(w_tap, w_in, w_out, pad):
    """Banded (Toeplitz) matrix for one kernel-row tap of a stride-1 transposed conv.

    w_tap: (K, Cin, Cout).  Returns M of shape (w_in*Cin, w_out*Cout) with
      M[jq*Cin + c, j*Cout + o] = w_tap[j + pad - jq, c, o]  if 0 <= j+pad-jq < K else 0
    so (row_fused @ M)[j*Cout + o] = sum_{q,c} in[j + pad - q, c] * w_tap[q, c, o].
    """
    K, cin, cout = w_tap.shape
    jq = jnp.arange(w_in)[:, None]
    j = jnp.arange(w_out)[None, :]
    q = j + pad - jq
    valid = (q >= 0) & (q < K)
    blk = jnp.where(valid[:, :, None, None], w_tap[jnp.clip(q, 0, K - 1)], 0.0)
    return jnp.transpose(blk, (0, 2, 1, 3)).reshape(w_in * cin, w_out * cout)


def _is_multi_tensorcore_chip():
    """True on chips with >1 TensorCore (v7x); used to pick the batch-grid strategy."""
    try:
        kind = jax.devices()[0].device_kind.lower()
    except Exception:
        return False
    return ("v7" in kind) or ("7x" in kind)


def make_forward(params, input_shape):
    """One-time weight preprocessing; returns a jitted forward(x_nchw) -> NCHW output."""
    B, Cin, H, W = input_shape
    H2 = H + _KE2 - 1 - 2 * _PE2            # == (H-1) + K2 - 1 - 2*P2 (pool folded)
    W2 = W + _KE2 - 1 - 2 * _PE2
    H3 = H2 + _K3 - 1 - 2 * _P3 + _OP3
    W3 = W2 + _K3 - 1 - 2 * _P3 + _OP3
    assert H2 >= 1 and W2 >= 1, "input spatial size too small (needs H, W >= 7)"

    C2 = params["w2"].shape[1]               # 16
    C3 = params["w3"].shape[1]               # 16

    # ---- one-time weight preprocessing (hoisted out of the per-call path) ----
    w1 = params["w1"][:, :, 0, 0].astype(jnp.float32)                     # (3, 4)
    b1 = params["b1"].astype(jnp.float32)                                 # (4,)
    w2t = jnp.transpose(params["w2"], (2, 3, 0, 1)).astype(jnp.float32)   # (2, 2, 4, 16)
    b2 = params["b2"].astype(jnp.float32)                                 # (16,)
    w3t = jnp.transpose(params["w3"], (2, 3, 0, 1)).astype(jnp.float32)   # (3, 3, 16, 16)
    b3 = params["b3"].astype(jnp.float32)                                 # (16,)

    # fold conv_1 (1x1, linear) into conv_2's taps; pool of a constant is the constant,
    # and all conv_2 taps are interior (pad=3 > K=2), so the bias fold is exact.
    w12t = jnp.einsum("cm,pqmo->pqco", w1, w2t)                           # (2, 2, 3, 16)
    b12 = b2 + jnp.einsum("m,pqmo->o", b1, w2t)                           # (16,)

    # fold avg_pool(2, stride=1) into conv_2: composite is a K=3, pad=4 transposed conv.
    # U[p', p] = multiplicity of (p, r) pairs with p - r + 1 == p'.
    U = jnp.array([[1.0, 0.0], [1.0, 1.0], [0.0, 1.0]], jnp.float32)      # (3, 2)
    w_eff = 0.25 * jnp.einsum("ap,bq,pqco->abco", U, U, w12t)             # (3, 3, 3, 16)

    # banded weights: one (W_in*Cin, W_out*Cout) matrix per kernel-row tap
    S = jnp.stack([_banded_weight(w_eff[p], W, W2, _PE2) for p in range(_KE2)])  # (3, 48, 160)
    T = jnp.stack([_banded_weight(w3t[p], W2, W3, _P3) for p in range(_K3)])     # (3, 160, 144)
    b2f = jnp.tile(b12, W2)[None, :]                                             # (1, 160)
    b3f = jnp.tile(b3, W3)[None, :]                                              # (1, 144)

    # O(W^2) guard: banded weights grow quadratically with width.  Keep them far below
    # the scoped VMEM limit (32 MiB default; 64 MiB physical on v7x) incl. double
    # buffering; beyond that the banded matmul must be tiled over output-width chunks.
    weight_bytes = 4 * (int(S.size) + int(T.size))
    assert weight_bytes < 8 * 1024 * 1024, (
        f"banded weights ({weight_bytes} B) too large; tile over W before scaling input")

    # batch strategy: one image per TensorCore on multi-TC chips (v7x), otherwise fold
    # the whole batch into a single grid step and unroll over B inside the kernel
    # (on single-TC v5e/v6e the grid is just a sequential loop with ~0.35us/step cost).
    if _is_multi_tensorcore_chip():
        grid, bblk = (B,), 1
    else:
        grid, bblk = (1,), B

    def kernel(x_ref, s_ref, b2_ref, t_ref, b3_ref, out_ref):
        for bi in range(bblk):                 # static unroll (1 on v7x, B on v5e/v6e)
            xb = x_ref[bi]                     # (H, W*Cin) width-fused, channels-last
            # conv_1 + avg_pool + conv_2 fused: 3 deep, lane-dense banded matmuls
            acc2 = b2_ref[...]                 # (1, W2*C2) -> broadcast
            for p in range(_KE2):
                acc2 = acc2 + jnp.dot(xb[_PE2 - p:_PE2 - p + H2, :], s_ref[p],
                                      preferred_element_type=jnp.float32)
            # acc2: (H2, W2*C2)

            # output_padding: zero-extend by one row as a value (the zero column
            # drops out of the banded matmul algebraically)
            ext = jnp.concatenate(
                [acc2, jnp.zeros((_OP3, W2 * C2), jnp.float32)], axis=0)  # (H2+1, W2*C2)

            # conv_3: one banded matmul (K=160, N=144) per kernel row p
            acc3 = b3_ref[...]                 # (1, W3*C3) -> broadcast
            for p in range(_K3):
                acc3 = acc3 + jnp.dot(ext[_P3 - p:_P3 - p + H3, :], t_ref[p],
                                      preferred_element_type=jnp.float32)
            # acc3: (H3, W3*C3) -- already lane-dense, store directly
            out_ref[bi] = jnp.maximum(acc3, 0.0)

    fused_call = pl.pallas_call(
        kernel,
        out_shape=jax.ShapeDtypeStruct((B, H3, W3 * C3), jnp.float32),
        grid_spec=pltpu.PrefetchScalarGridSpec(
            num_scalar_prefetch=0,
            grid=grid,
            in_specs=[
                pl.BlockSpec((bblk, H, W * Cin), lambda b: (b, 0, 0)),
                pl.BlockSpec(S.shape, lambda b: (0, 0, 0)),
                pl.BlockSpec(b2f.shape, lambda b: (0, 0)),
                pl.BlockSpec(T.shape, lambda b: (0, 0, 0)),
                pl.BlockSpec(b3f.shape, lambda b: (0, 0)),
            ],
            out_specs=pl.BlockSpec((bblk, H3, W3 * C3), lambda b: (b, 0, 0)),
        ),
        compiler_params=pltpu.CompilerParams(dimension_semantics=("parallel",)),
    )

    @jax.jit
    def forward(x_nchw):
        # NCHW -> NHWC -> width-fused (B, H, W*Cin): lane-denser input (48 vs 3 lanes)
        x = jnp.transpose(x_nchw, (0, 2, 3, 1)).astype(jnp.float32)
        x = x.reshape(B, H, W * Cin)
        out_fused = fused_call(x, S, b2f, T, b3f)            # (B, H3, W3*C3) lane-dense
        out = out_fused.reshape(B, H3, W3, C3)                # NHWC
        return jnp.transpose(out, (0, 3, 1, 2))               # back to NCHW

    return forward


def reference_forward(x_nchw, params):
    """Pure-JAX reference (faithful op order: conv1 -> pool -> conv2 -> conv3 -> relu)."""
    x = jnp.transpose(x_nchw, (0, 2, 3, 1)).astype(jnp.float32)
    y1 = jnp.einsum("bhwc,co->bhwo", x, params["w1"][:, :, 0, 0]) + params["b1"]
    y2 = 0.25 * (y1[:, :-1, :-1] + y1[:, 1:, :-1] + y1[:, :-1, 1:] + y1[:, 1:, 1:])
    B, Hp, Wp, _ = y2.shape
    H2, W2 = Hp + _K2 - 1 - 2 * _P2, Wp + _K2 - 1 - 2 * _P2
    acc2 = jnp.zeros((B, H2, W2, params["w2"].shape[1]), jnp.float32) + params["b2"]
    for p in range(_K2):
        for q in range(_K2):
            acc2 = acc2 + jnp.einsum(
                "bhwc,co->bhwo",
                y2[:, _P2 - p:_P2 - p + H2, _P2 - q:_P2 - q + W2],
                params["w2"][:, :, p, q])
    H3 = H2 + _K3 - 1 - 2 * _P3 + _OP3
    W3 = W2 + _K3 - 1 - 2 * _P3 + _OP3
    ext = jnp.pad(acc2, ((0, 0), (0, _OP3), (0, _OP3), (0, 0)))
    acc3 = jnp.zeros((B, H3, W3, params["w3"].shape[1]), jnp.float32) + params["b3"]
    for p in range(_K3):
        for q in range(_K3):
            acc3 = acc3 + jnp.einsum(
                "bhwc,co->bhwo",
                ext[:, _P3 - p:_P3 - p + H3, _P3 - q:_P3 - q + W3],
                params["w3"][:, :, p, q])
    return jnp.transpose(jnp.maximum(acc3, 0.0), (0, 3, 1, 2))


def init_params(key):
    ks = jax.random.split(key, 6)

    def u(k, shape, fan_in):
        bound = 1.0 / (fan_in ** 0.5)
        return jax.random.uniform(k, shape, jnp.float32, -bound, bound)

    return {
        # ConvTranspose2d weight layout: (in_channels, out_channels, kH, kW)
        "w1": u(ks[0], (3, 4, 1, 1), 3),
        "b1": u(ks[1], (4,), 3),
        "w2": u(ks[2], (4, 16, 2, 2), 4 * 2 * 2),
        "b2": u(ks[3], (16,), 4 * 2 * 2),
        "w3": u(ks[4], (16, 16, 3, 3), 16 * 3 * 3),
        "b3": u(ks[5], (16,), 16 * 3 * 3),
    }


if __name__ == "__main__":
    key = jax.random.PRNGKey(0)
    k_x, k_p = jax.random.split(key)

    B, C, H, W = 2, 3, 16, 16          # small shapes consistent with the module
    x = jax.random.normal(k_x, (B, C, H, W), jnp.float32)
    params = init_params(k_p)

    forward = make_forward(params, (B, C, H, W))   # one-time weight prep + jit
    out = jax.block_until_ready(forward(x))

    ref = reference_forward(x, params)
    assert out.shape == ref.shape, (out.shape, ref.shape)
    assert jnp.allclose(out, ref, atol=5e-4, rtol=5e-4), float(jnp.max(jnp.abs(out - ref)))

    print("KERNEL_OK")
</pallas_src>

<mosaic_0001>
module attributes {stable_mosaic.version = 11 : i64} {
  func.func @kernel(%arg0: i32, %arg1: memref<2x16x48xf32, #tpu.memory_space<vmem>>, %arg2: memref<3x48x160xf32, #tpu.memory_space<vmem>>, %arg3: memref<1x160xf32, #tpu.memory_space<vmem>>, %arg4: memref<3x160x144xf32, #tpu.memory_space<vmem>>, %arg5: memref<1x144xf32, #tpu.memory_space<vmem>>, %arg6: memref<2x9x144xf32, #tpu.memory_space<vmem>>) attributes {dimension_semantics = [#tpu.dimension_semantics<parallel>], iteration_bounds = array<i64: 1>, scalar_prefetch = 0 : i64, scratch_operands = 0 : i64, tpu.core_type = #tpu.core_type<tc>, window_params = [{transform_indices = @transform_0, window_bounds = array<i64: 2, 16, 48>}, {pipeline_mode = #tpu.pipeline_mode<synchronous>, transform_indices = @transform_1, window_bounds = array<i64: 3, 48, 160>}, {pipeline_mode = #tpu.pipeline_mode<synchronous>, transform_indices = @transform_2, window_bounds = array<i64: 1, 160>}, {pipeline_mode = #tpu.pipeline_mode<synchronous>, transform_indices = @transform_3, window_bounds = array<i64: 3, 160, 144>}, {pipeline_mode = #tpu.pipeline_mode<synchronous>, transform_indices = @transform_4, window_bounds = array<i64: 1, 144>}, {transform_indices = @transform_5, window_bounds = array<i64: 2, 9, 144>}]} {
    %c0 = arith.constant 0 : index
    %c0_0 = arith.constant 0 : index
    %c0_1 = arith.constant 0 : index
    %0 = vector.load %arg1[%c0, %c0_0, %c0_1] : memref<2x16x48xf32, #tpu.memory_space<vmem>>, vector<1x16x48xf32>
    %1 = vector.shape_cast %0 : vector<1x16x48xf32> to vector<16x48xf32>
    %c0_2 = arith.constant 0 : index
    %c0_3 = arith.constant 0 : index
    %2 = vector.load %arg3[%c0_2, %c0_3] : memref<1x160xf32, #tpu.memory_space<vmem>>, vector<1x160xf32>
    %3 = vector.extract_strided_slice %1 {offsets = [4, 0], sizes = [10, 48], strides = [1, 1]} : vector<16x48xf32> to vector<10x48xf32>
    %c0_4 = arith.constant 0 : index
    %c0_5 = arith.constant 0 : index
    %c0_6 = arith.constant 0 : index
    %4 = vector.load %arg2[%c0_4, %c0_5, %c0_6] : memref<3x48x160xf32, #tpu.memory_space<vmem>>, vector<1x48x160xf32>
    %5 = vector.shape_cast %4 : vector<1x48x160xf32> to vector<48x160xf32>
    %cst = arith.constant dense<0.000000e+00> : vector<10x160xf32>
    %6 = tpu.matmul %3, %5, %cst {dimension_numbers = #tpu.dot_dimension_numbers<[1], [0], [0], [1], [0, 0, 1, 1], [], []>} : vector<10x48xf32>, vector<48x160xf32>, vector<10x160xf32> -> vector<10x160xf32>
    %7 = vector.broadcast %2 : vector<1x160xf32> to vector<10x160xf32>
    %8 = arith.addf %7, %6 : vector<10x160xf32>
    %9 = vector.extract_strided_slice %1 {offsets = [3, 0], sizes = [10, 48], strides = [1, 1]} : vector<16x48xf32> to vector<10x48xf32>
    %c1 = arith.constant 1 : index
    %c0_7 = arith.constant 0 : index
    %c0_8 = arith.constant 0 : index
    %10 = vector.load %arg2[%c1, %c0_7, %c0_8] : memref<3x48x160xf32, #tpu.memory_space<vmem>>, vector<1x48x160xf32>
    %11 = vector.shape_cast %10 : vector<1x48x160xf32> to vector<48x160xf32>
    %cst_9 = arith.constant dense<0.000000e+00> : vector<10x160xf32>
    %12 = tpu.matmul %9, %11, %cst_9 {dimension_numbers = #tpu.dot_dimension_numbers<[1], [0], [0], [1], [0, 0, 1, 1], [], []>} : vector<10x48xf32>, vector<48x160xf32>, vector<10x160xf32> -> vector<10x160xf32>
    %13 = arith.addf %8, %12 : vector<10x160xf32>
    %14 = vector.extract_strided_slice %1 {offsets = [2, 0], sizes = [10, 48], strides = [1, 1]} : vector<16x48xf32> to vector<10x48xf32>
    %c2 = arith.constant 2 : index
    %c0_10 = arith.constant 0 : index
    %c0_11 = arith.constant 0 : index
    %15 = vector.load %arg2[%c2, %c0_10, %c0_11] : memref<3x48x160xf32, #tpu.memory_space<vmem>>, vector<1x48x160xf32>
    %16 = vector.shape_cast %15 : vector<1x48x160xf32> to vector<48x160xf32>
    %cst_12 = arith.constant dense<0.000000e+00> : vector<10x160xf32>
    %17 = tpu.matmul %14, %16, %cst_12 {dimension_numbers = #tpu.dot_dimension_numbers<[1], [0], [0], [1], [0, 0, 1, 1], [], []>} : vector<10x48xf32>, vector<48x160xf32>, vector<10x160xf32> -> vector<10x160xf32>
    %18 = arith.addf %13, %17 : vector<10x160xf32>
    %cst_13 = arith.constant 0.000000e+00 : f32
    %19 = vector.broadcast %cst_13 : f32 to vector<1x160xf32>
    %20 = tpu.concatenate %18, %19 in 0 : vector<10x160xf32>, vector<1x160xf32> -> vector<11x160xf32>
    %c0_14 = arith.constant 0 : index
    %c0_15 = arith.constant 0 : index
    %21 = vector.load %arg5[%c0_14, %c0_15] : memref<1x144xf32, #tpu.memory_space<vmem>>, vector<1x144xf32>
    %22 = vector.extract_strided_slice %20 {offsets = [2, 0], sizes = [9, 160], strides = [1, 1]} : vector<11x160xf32> to vector<9x160xf32>
    %c0_16 = arith.constant 0 : index
    %c0_17 = arith.constant 0 : index
    %c0_18 = arith.constant 0 : index
    %23 = vector.load %arg4[%c0_16, %c0_17, %c0_18] : memref<3x160x144xf32, #tpu.memory_space<vmem>>, vector<1x160x144xf32>
    %24 = vector.shape_cast %23 : vector<1x160x144xf32> to vector<160x144xf32>
    %cst_19 = arith.constant dense<0.000000e+00> : vector<9x144xf32>
    %25 = tpu.matmul %22, %24, %cst_19 {dimension_numbers = #tpu.dot_dimension_numbers<[1], [0], [0], [1], [0, 0, 1, 1], [], []>} : vector<9x160xf32>, vector<160x144xf32>, vector<9x144xf32> -> vector<9x144xf32>
    %26 = vector.broadcast %21 : vector<1x144xf32> to vector<9x144xf32>
    %27 = arith.addf %26, %25 : vector<9x144xf32>
    %28 = vector.extract_strided_slice %20 {offsets = [1, 0], sizes = [9, 160], strides = [1, 1]} : vector<11x160xf32> to vector<9x160xf32>
    %c1_20 = arith.constant 1 : index
    %c0_21 = arith.constant 0 : index
    %c0_22 = arith.constant 0 : index
    %29 = vector.load %arg4[%c1_20, %c0_21, %c0_22] : memref<3x160x144xf32, #tpu.memory_space<vmem>>, vector<1x160x144xf32>
    %30 = vector.shape_cast %29 : vector<1x160x144xf32> to vector<160x144xf32>
    %cst_23 = arith.constant dense<0.000000e+00> : vector<9x144xf32>
    %31 = tpu.matmul %28, %30, %cst_23 {dimension_numbers = #tpu.dot_dimension_numbers<[1], [0], [0], [1], [0, 0, 1, 1], [], []>} : vector<9x160xf32>, vector<160x144xf32>, vector<9x144xf32> -> vector<9x144xf32>
    %32 = arith.addf %27, %31 : vector<9x144xf32>
    %33 = vector.extract_strided_slice %20 {offsets = [0, 0], sizes = [9, 160], strides = [1, 1]} : vector<11x160xf32> to vector<9x160xf32>
    %c2_24 = arith.constant 2 : index
    %c0_25 = arith.constant 0 : index
    %c0_26 = arith.constant 0 : index
    %34 = vector.load %arg4[%c2_24, %c0_25, %c0_26] : memref<3x160x144xf32, #tpu.memory_space<vmem>>, vector<1x160x144xf32>
    %35 = vector.shape_cast %34 : vector<1x160x144xf32> to vector<160x144xf32>
    %cst_27 = arith.constant dense<0.000000e+00> : vector<9x144xf32>
    %36 = tpu.matmul %33, %35, %cst_27 {dimension_numbers = #tpu.dot_dimension_numbers<[1], [0], [0], [1], [0, 0, 1, 1], [], []>} : vector<9x160xf32>, vector<160x144xf32>, vector<9x144xf32> -> vector<9x144xf32>
    %37 = arith.addf %32, %36 : vector<9x144xf32>
    %cst_28 = arith.constant 0.000000e+00 : f32
    %38 = vector.broadcast %cst_28 : f32 to vector<9x144xf32>
    %39 = arith.maximumf %37, %38 : vector<9x144xf32>
    %c0_29 = arith.constant 0 : index
    %c0_30 = arith.constant 0 : index
    %c0_31 = arith.constant 0 : index
    %40 = vector.load %arg6[%c0_29, %c0_30, %c0_31] : memref<2x9x144xf32, #tpu.memory_space<vmem>>, vector<1x9x144xf32>
    %41 = vector.shape_cast %40 : vector<1x9x144xf32> to vector<9x144xf32>
    %42 = vector.shape_cast %39 : vector<9x144xf32> to vector<1x9x144xf32>
    tpu.vector_store %arg6[%c0_29, %c0_30, %c0_31], %42 {strides = array<i32>} : memref<2x9x144xf32, #tpu.memory_space<vmem>>, vector<1x9x144xf32>,
    %c1_32 = arith.constant 1 : index
    %c0_33 = arith.constant 0 : index
    %c0_34 = arith.constant 0 : index
    %43 = vector.load %arg1[%c1_32, %c0_33, %c0_34] : memref<2x16x48xf32, #tpu.memory_space<vmem>>, vector<1x16x48xf32>
    %44 = vector.shape_cast %43 : vector<1x16x48xf32> to vector<16x48xf32>
    %c0_35 = arith.constant 0 : index
    %c0_36 = arith.constant 0 : index
    %45 = vector.load %arg3[%c0_35, %c0_36] : memref<1x160xf32, #tpu.memory_space<vmem>>, vector<1x160xf32>
    %46 = vector.extract_strided_slice %44 {offsets = [4, 0], sizes = [10, 48], strides = [1, 1]} : vector<16x48xf32> to vector<10x48xf32>
    %c0_37 = arith.constant 0 : index
    %c0_38 = arith.constant 0 : index
    %c0_39 = arith.constant 0 : index
    %47 = vector.load %arg2[%c0_37, %c0_38, %c0_39] : memref<3x48x160xf32, #tpu.memory_space<vmem>>, vector<1x48x160xf32>
    %48 = vector.shape_cast %47 : vector<1x48x160xf32> to vector<48x160xf32>
    %cst_40 = arith.constant dense<0.000000e+00> : vector<10x160xf32>
    %49 = tpu.matmul %46, %48, %cst_40 {dimension_numbers = #tpu.dot_dimension_numbers<[1], [0], [0], [1], [0, 0, 1, 1], [], []>} : vector<10x48xf32>, vector<48x160xf32>, vector<10x160xf32> -> vector<10x160xf32>
    %50 = vector.broadcast %45 : vector<1x160xf32> to vector<10x160xf32>
    %51 = arith.addf %50, %49 : vector<10x160xf32>
    %52 = vector.extract_strided_slice %44 {offsets = [3, 0], sizes = [10, 48], strides = [1, 1]} : vector<16x48xf32> to vector<10x48xf32>
    %c1_41 = arith.constant 1 : index
    %c0_42 = arith.constant 0 : index
    %c0_43 = arith.constant 0 : index
    %53 = vector.load %arg2[%c1_41, %c0_42, %c0_43] : memref<3x48x160xf32, #tpu.memory_space<vmem>>, vector<1x48x160xf32>
    %54 = vector.shape_cast %53 : vector<1x48x160xf32> to vector<48x160xf32>
    %cst_44 = arith.constant dense<0.000000e+00> : vector<10x160xf32>
    %55 = tpu.matmul %52, %54, %cst_44 {dimension_numbers = #tpu.dot_dimension_numbers<[1], [0], [0], [1], [0, 0, 1, 1], [], []>} : vector<10x48xf32>, vector<48x160xf32>, vector<10x160xf32> -> vector<10x160xf32>
    %56 = arith.addf %51, %55 : vector<10x160xf32>
    %57 = vector.extract_strided_slice %44 {offsets = [2, 0], sizes = [10, 48], strides = [1, 1]} : vector<16x48xf32> to vector<10x48xf32>
    %c2_45 = arith.constant 2 : index
    %c0_46 = arith.constant 0 : index
    %c0_47 = arith.constant 0 : index
    %58 = vector.load %arg2[%c2_45, %c0_46, %c0_47] : memref<3x48x160xf32, #tpu.memory_space<vmem>>, vector<1x48x160xf32>
    %59 = vector.shape_cast %58 : vector<1x48x160xf32> to vector<48x160xf32>
    %cst_48 = arith.constant dense<0.000000e+00> : vector<10x160xf32>
    %60 = tpu.matmul %57, %59, %cst_48 {dimension_numbers = #tpu.dot_dimension_numbers<[1], [0], [0], [1], [0, 0, 1, 1], [], []>} : vector<10x48xf32>, vector<48x160xf32>, vector<10x160xf32> -> vector<10x160xf32>
    %61 = arith.addf %56, %60 : vector<10x160xf32>
    %cst_49 = arith.constant 0.000000e+00 : f32
    %62 = vector.broadcast %cst_49 : f32 to vector<1x160xf32>
    %63 = tpu.concatenate %61, %62 in 0 : vector<10x160xf32>, vector<1x160xf32> -> vector<11x160xf32>
    %c0_50 = arith.constant 0 : index
    %c0_51 = arith.constant 0 : index
    %64 = vector.load %arg5[%c0_50, %c0_51] : memref<1x144xf32, #tpu.memory_space<vmem>>, vector<1x144xf32>
    %65 = vector.extract_strided_slice %63 {offsets = [2, 0], sizes = [9, 160], strides = [1, 1]} : vector<11x160xf32> to vector<9x160xf32>
    %c0_52 = arith.constant 0 : index
    %c0_53 = arith.constant 0 : index
    %c0_54 = arith.constant 0 : index
    %66 = vector.load %arg4[%c0_52, %c0_53, %c0_54] : memref<3x160x144xf32, #tpu.memory_space<vmem>>, vector<1x160x144xf32>
    %67 = vector.shape_cast %66 : vector<1x160x144xf32> to vector<160x144xf32>
    %cst_55 = arith.constant dense<0.000000e+00> : vector<9x144xf32>
    %68 = tpu.matmul %65, %67, %cst_55 {dimension_numbers = #tpu.dot_dimension_numbers<[1], [0], [0], [1], [0, 0, 1, 1], [], []>} : vector<9x160xf32>, vector<160x144xf32>, vector<9x144xf32> -> vector<9x144xf32>
    %69 = vector.broadcast %64 : vector<1x144xf32> to vector<9x144xf32>
    %70 = arith.addf %69, %68 : vector<9x144xf32>
    %71 = vector.extract_strided_slice %63 {offsets = [1, 0], sizes = [9, 160], strides = [1, 1]} : vector<11x160xf32> to vector<9x160xf32>
    %c1_56 = arith.constant 1 : index
    %c0_57 = arith.constant 0 : index
    %c0_58 = arith.constant 0 : index
    %72 = vector.load %arg4[%c1_56, %c0_57, %c0_58] : memref<3x160x144xf32, #tpu.memory_space<vmem>>, vector<1x160x144xf32>
    %73 = vector.shape_cast %72 : vector<1x160x144xf32> to vector<160x144xf32>
    %cst_59 = arith.constant dense<0.000000e+00> : vector<9x144xf32>
    %74 = tpu.matmul %71, %73, %cst_59 {dimension_numbers = #tpu.dot_dimension_numbers<[1], [0], [0], [1], [0, 0, 1, 1], [], []>} : vector<9x160xf32>, vector<160x144xf32>, vector<9x144xf32> -> vector<9x144xf32>
    %75 = arith.addf %70, %74 : vector<9x144xf32>
    %76 = vector.extract_strided_slice %63 {offsets = [0, 0], sizes = [9, 160], strides = [1, 1]} : vector<11x160xf32> to vector<9x160xf32>
    %c2_60 = arith.constant 2 : index
    %c0_61 = arith.constant 0 : index
    %c0_62 = arith.constant 0 : index
    %77 = vector.load %arg4[%c2_60, %c0_61, %c0_62] : memref<3x160x144xf32, #tpu.memory_space<vmem>>, vector<1x160x144xf32>
    %78 = vector.shape_cast %77 : vector<1x160x144xf32> to vector<160x144xf32>
    %cst_63 = arith.constant dense<0.000000e+00> : vector<9x144xf32>
    %79 = tpu.matmul %76, %78, %cst_63 {dimension_numbers = #tpu.dot_dimension_numbers<[1], [0], [0], [1], [0, 0, 1, 1], [], []>} : vector<9x160xf32>, vector<160x144xf32>, vector<9x144xf32> -> vector<9x144xf32>
    %80 = arith.addf %75, %79 : vector<9x144xf32>
    %cst_64 = arith.constant 0.000000e+00 : f32
    %81 = vector.broadcast %cst_64 : f32 to vector<9x144xf32>
    %82 = arith.maximumf %80, %81 : vector<9x144xf32>
    %c1_65 = arith.constant 1 : index
    %c0_66 = arith.constant 0 : index
    %c0_67 = arith.constant 0 : index
    %83 = vector.load %arg6[%c1_65, %c0_66, %c0_67] : memref<2x9x144xf32, #tpu.memory_space<vmem>>, vector<1x9x144xf32>
    %84 = vector.shape_cast %83 : vector<1x9x144xf32> to vector<9x144xf32>
    %85 = vector.shape_cast %82 : vector<9x144xf32> to vector<1x9x144xf32>
    tpu.vector_store %arg6[%c1_65, %c0_66, %c0_67], %85 {strides = array<i32>} : memref<2x9x144xf32, #tpu.memory_space<vmem>>, vector<1x9x144xf32>,
    return
  }
  func.func @transform_0(%arg0: i32) -> (i32, i32, i32) {
    %c0_i32 = arith.constant 0 : i32
    %c0_i32_0 = arith.constant 0 : i32
    %c0_i32_1 = arith.constant 0 : i32
    return %arg0, %c0_i32, %c0_i32_0 : i32, i32, i32
  }
  func.func @transform_1(%arg0: i32) -> (i32, i32, i32) {
    %c0_i32 = arith.constant 0 : i32
    %c0_i32_0 = arith.constant 0 : i32
    %c0_i32_1 = arith.constant 0 : i32
    %c0_i32_2 = arith.constant 0 : i32
    return %c0_i32, %c0_i32_0, %c0_i32_1 : i32, i32, i32
  }
  func.func @transform_2(%arg0: i32) -> (i32, i32) {
    %c0_i32 = arith.constant 0 : i32
    %c0_i32_0 = arith.constant 0 : i32
    %c0_i32_1 = arith.constant 0 : i32
    return %c0_i32, %c0_i32_0 : i32, i32
  }
  func.func @transform_3(%arg0: i32) -> (i32, i32, i32) {
    %c0_i32 = arith.constant 0 : i32
    %c0_i32_0 = arith.constant 0 : i32
    %c0_i32_1 = arith.constant 0 : i32
    %c0_i32_2 = arith.constant 0 : i32
    return %c0_i32, %c0_i32_0, %c0_i32_1 : i32, i32, i32
  }
  func.func @transform_4(%arg0: i32) -> (i32, i32) {
    %c0_i32 = arith.constant 0 : i32
    %c0_i32_0 = arith.constant 0 : i32
    %c0_i32_1 = arith.constant 0 : i32
    return %c0_i32, %c0_i32_0 : i32, i32
  }
  func.func @transform_5(%arg0: i32) -> (i32, i32, i32) {
    %c0_i32 = arith.constant 0 : i32
    %c0_i32_0 = arith.constant 0 : i32
    %c0_i32_1 = arith.constant 0 : i32
    return %arg0, %c0_i32, %c0_i32_0 : i32, i32, i32
  }
}

</mosaic_0001>

<bundles_post_ra>
// kernel: forward.1
= control target key start
LH: loop header
LB: loop body
LE: loop exit
PB: predicated region body
PF: predicated region fallthrough
CT: control target
= control target key end

     0   :  { %10 = vsyncpa [#allocation3], 0  ;;  %s1988_s18 = smov [#allocation2]   ;;  %s2559_s0 = inlined_call_operand.vmem [shape: f32[2,16,48], index: 0, kind: input, shape index: {}]   ;;  %s2560_s1 = inlined_call_operand.vmem [shape: f32[3,48,160], index: 1, kind: input, shape index: {}]   ;;  %s2561_s2 = inlined_call_operand.vmem [shape: f32[1,160], index: 2, kind: input, shape index: {}]   ;;  %s2562_s3 = inlined_call_operand.hbm [shape: f32[3,160,144], index: 3, kind: input, shape index: {}]   ;;  %s2563_s4 = inlined_call_operand.vmem [shape: f32[1,144], index: 4, kind: input, shape index: {}]   ;;  %s2564_s5 = inlined_call_operand.vmem [shape: f32[2,9,144], index: 5, kind: output, shape index: {}]  }
   0x1   :  { %s22_s19 = sshll.u32 %s1988_s18, 4  ;;  %s1964_s22 = scalar_lea.hbm %s2562_s3, 15360  ;;  %s23_s19 = int_to_ptr.vmem [resolvable:$true] %s22_s19 }
   0x2   :  { %p1965_p0 = scmp.ne.s32.totalorder %s2562_s3, %s1964_s22  ;;  %p1968_p1 = scmp.lt.u32.totalorder %s1964_s22, %s2562_s3 }
   0x4   :  { %p1970_p2 = pnand %p1968_p1, %p1965_p0 }
   0x6   :  { %1973 = shalt.err (!%p1970_p2)
}
   0x7   :  { %s1974_s27 = scalar_lea.vmem %s23_s19, 15360  ;;  %p1979_p4 = scmp.lt.s32.totalorder %s23_s19, %s23_s19 }
   0x8   :  { %p1975_p3 = scmp.ne.s32.totalorder %s23_s19, %s1974_s27  ;;  %p1980_p5 = scmp.lt.s32.totalorder %s1974_s27, %s1974_s27 }
   0xa   :  { %p1981_p6 = por %p1980_p5, %p1979_p4 }
   0xc   :  { %p1982_p7 = pnand %p1981_p6, %p1975_p3 }
   0xe   :  { %1985 = shalt.err (!%p1982_p7)
}
   0xf   :  { %s1989_s28 = smov 256   ;;  %s1990_s29 = smov 16  }
  0x10   :  { %28 = dma.hbm_to_vmem [thread:$0]  %s2562_s3, 15360, %s23_s19, [#allocation3], %s1989_s28, %s1989_s28, %s1990_s29  }
  0x11   :  { %1986 = dma.done.wait [#allocation3], 15360  }
  0x12   :  { %1987 = vsyncadd [#allocation3], 4294951936  ;;  %v1991_v0 = vmov 0.0   ;;  %v38_v1 = vld [vmem:[%s2560_s1 + $0x8] sm:$0xff]  ;;  %v40_v2 = vld [vmem:[%s2560_s1 + $0x18] sm:$0xff]  ;;  %vm51_vm0 = vcmask 1043456  }
  0x13   :  { %124 = vmatprep.mubr.f32.mxu0 %v1991_v0  ;;  %v37_v3 = vld [vmem:[%s2560_s1] sm:$0xff]  ;;  %v2044_v4 = vpack.c.bf16 %v40_v2, %v38_v1  ;;  %v39_v5 = vld [vmem:[%s2560_s1 + $0x10] sm:$0xff]  ;;  %v42_v6 = vld [vmem:[%s2560_s1 + $0x28] sm:$0xff]  ;;  %vm55_vm1 = vcmask 392192   ;;  %vm165_vm2 = vcmask 1044480   ;;  %vm267_vm3 = vcmask 1045504  }
  0x14   :  { %v44_v7 = vld [vmem:[%s2560_s1 + $0x38] sm:$0xff]  ;;  %v2055_v8 = vpack.c.bf16 %v39_v5, %v37_v3  ;;  %v41_v10 = vld [vmem:[%s2560_s1 + $0x20] sm:$0xff]  ;;  %v43_v11 = vld [vmem:[%s2560_s1 + $0x30] sm:$0xff]  ;;  %vm356_vm4 = vcmask 1041408   ;;  %vm412_vm5 = vcmask 261120   ;;  %vm550_vm6 = vcmask 1046528  }
  0x15   :  { %v2057_v9 = vpack.c.bf16 %v44_v7, %v42_v6  ;;  %v46_v12 = vld [vmem:[%s2560_s1 + $0x48] sm:$0xff]  ;;  %1601 = vmatprep.subr.bf16.mxu0 %v2044_v4  ;;  %v48_v13 = vld [vmem:[%s2560_s1 + $0x58] sm:$0xff]  ;;  %v2073_v14 = vpack.c.bf16 %v43_v11, %v41_v10  ;;  %v45_v15 = vld [vmem:[%s2560_s1 + $0x40] sm:$0xff]  ;;  %vm775_vm7 = vcmask 130048   ;;  %vm778_vm8 = vcmask 122880  }
  0x16   :  { %1603 = vmatpush1.bf16.msra.mxu0 %v2055_v8  ;;  %v2079_v16 = vpack.c.bf16 %v48_v13, %v46_v12  ;;  %v47_v17 = vld [vmem:[%s2560_s1 + $0x50] sm:$0xff]  ;;  %v2087_v18 = vld [vmem:[%s2559_s0] sm:$0xff]  ;;  %v2092_v19 = vld [vmem:[%s2559_s0 + $0x8] sm:$0xff] }
  0x17   :  { %1605 = vmatprep.subr.bf16.mxu0 %v2057_v9  ;;  %v1523_v20 = vld [vmem:[%s2560_s1 + $0x68] sm:$0xff]  ;;  %v1525_v21 = vld [vmem:[%s2560_s1 + $0x78] sm:$0xff]  ;;  %v2101_v22 = vpack.c.bf16 %v47_v17, %v45_v15  ;;  %v52_v23 = vrot.slane %v2087_v18, 4  ;;  %v53_v24 = vrot.slane %v2092_v19, 4  ;;  %v1522_v26 = vld [vmem:[%s2560_s1 + $0x60] sm:$0xff]  ;;  %v166_v60 = vrot.slane %v2087_v18, 3 }
  0x18   :  { %v2106_v25 = vpack.c.bf16 %v1525_v21, %v1523_v20  ;;  %v1524_v27 = vld [vmem:[%s2560_s1 + $0x70] sm:$0xff]  ;;  %v1527_v28 = vld [vmem:[%s2560_s1 + $0x88] sm:$0xff]  ;;  %v1529_v29 = vld [vmem:[%s2560_s1 + $0x98] sm:$0xff]  ;;  %v167_v61 = vrot.slane %v2092_v19, 3 }
  0x19   :  { %v54_v30 = vsel %vm51_vm0, %v52_v23, %v53_v24  ;;  %v2122_v31 = vpack.c.bf16 %v1524_v27, %v1522_v26  ;;  %v1526_v32 = vld [vmem:[%s2560_s1 + $0x80] sm:$0xff]  ;;  %v1528_v33 = vld [vmem:[%s2560_s1 + $0x90] sm:$0xff]  ;;  %v2131_v34 = vpack.c.bf16 %v1529_v29, %v1527_v28  ;;  %v1531_v35 = vld [vmem:[%s2560_s1 + $0xa8] sm:$0xff] }
  0x1a   :  { %1607 = vmatpush1.bf16.msra.mxu0 %v2073_v14  ;;  %v1533_v36 = vld [vmem:[%s2560_s1 + $0xb8] sm:$0xff]  ;;  %v361_v37 = vld [vmem:[#allocation2 + $0x8] sm:$0xff]  ;;  %v360_v39 = vld [vmem:[#allocation2] sm:$0xff]  ;;  %v2145_v46 = vpack.c.bf16 %v1528_v33, %v1526_v32  ;;  %v168_v15 = vsel %vm165_vm2, %v166_v60, %v167_v61 }
  0x1b   :  { %1609 = vmatprep.subr.bf16.mxu0 %v2079_v16  ;;  %v363_v38 = vld [vmem:[#allocation2 + $0x18] sm:$0xff]  ;;  %v362_v40 = vld [vmem:[#allocation2 + $0x10] sm:$0xff]  ;;  %v365_v43 = vld [vmem:[#allocation2 + $0x28] sm:$0xff]  ;;  %v2151_v51 = vpack.c.bf16 %v1533_v36, %v1531_v35 }
  0x1c   :  { %v2140_v41 = vpack.c.bf16 %v363_v38, %v361_v37  ;;  %v2142_v42 = vpack.c.bf16 %v362_v40, %v360_v39  ;;  %v367_v44 = vld [vmem:[#allocation2 + $0x38] sm:$0xff]  ;;  %v364_v45 = vld [vmem:[#allocation2 + $0x20] sm:$0xff]  ;;  %v366_v48 = vld [vmem:[#allocation2 + $0x30] sm:$0xff] }
  0x1d   :  { %v2148_v47 = vpack.c.bf16 %v367_v44, %v365_v43  ;;  %v369_v49 = vld [vmem:[#allocation2 + $0x48] sm:$0xff]  ;;  %v371_v50 = vld [vmem:[#allocation2 + $0x58] sm:$0xff]  ;;  %v1530_v52 = vld [vmem:[%s2560_s1 + $0xa0] sm:$0xff]  ;;  %v2167_v56 = vpack.c.bf16 %v366_v48, %v364_v45 }
  0x1e   :  { %1611 = vmatpush1.bf16.msra.mxu0 %v2101_v22  ;;  %v1532_v53 = vld [vmem:[%s2560_s1 + $0xb0] sm:$0xff]  ;;  %1637 = vmatprep.subr.bf16.mxu1 %v2140_v41  ;;  %v1537_v54 = vld [vmem:[%s2560_s1 + $0xc8] sm:$0xff]  ;;  %v1539_v55 = vld [vmem:[%s2560_s1 + $0xd8] sm:$0xff]  ;;  %v2171_v57 = vpack.c.bf16 %v371_v50, %v369_v49  ;;  %v268_v49 = vrot.slane %v2087_v18, 2  ;;  %v269_v50 = vrot.slane %v2092_v19, 2 }
  0x1f   :  { %1613 = vmatprep.subr.bf16.mxu0 %v2106_v25  ;;  %1639 = vmatpush1.bf16.msra.mxu1 %v2142_v42  ;;  %v368_v58 = vld [vmem:[#allocation2 + $0x40] sm:$0xff]  ;;  %v370_v59 = vld [vmem:[#allocation2 + $0x50] sm:$0xff]  ;;  %v2176_v62 = vpack.c.bf16 %v1532_v53, %v1530_v52  ;;  %v373_v63 = vld [vmem:[#allocation2 + $0x68] sm:$0xff]  ;;  %v2180_v2 = vpack.c.bf16 %v1539_v55, %v1537_v54 }
  0x20   :  { %1641 = vmatprep.subr.bf16.mxu1 %v2148_v47  ;;  %v375_v1 = vld [vmem:[#allocation2 + $0x78] sm:$0xff]  ;;  %v1536_v3 = vld [vmem:[%s2560_s1 + $0xc0] sm:$0xff]  ;;  %v1538_v5 = vld [vmem:[%s2560_s1 + $0xd0] sm:$0xff]  ;;  %v2195_v10 = vpack.c.bf16 %v370_v59, %v368_v58  ;;  %v270_v59 = vsel %vm267_vm3, %v268_v49, %v269_v50 }
  0x21   :  { %1520 = vmatmul.mubr.msk.f32.vlgmr.msra.gmra.mrb[0].mxu0 %vm55_vm1, %v54_v30  ;;  %v1541_v6 = vld [vmem:[%s2560_s1 + $0xe8] sm:$0xff]  ;;  %v1543_v7 = vld [vmem:[%s2560_s1 + $0xf8] sm:$0xff]  ;;  %v2198_v11 = vpack.c.bf16 %v375_v1, %v373_v63  ;;  %v372_v12 = vld [vmem:[#allocation2 + $0x60] sm:$0xff]  ;;  %v2202_v17 = vpack.c.bf16 %v1538_v5, %v1536_v3 }
  0x22   :  { %1615 = vmatpush1.bf16.msra.mxu0 %v2122_v31  ;;  %130 = vmatprep.mubr.f32.mxu0 %v1991_v0  ;;  %v374_v13 = vld [vmem:[#allocation2 + $0x70] sm:$0xff]  ;;  %v377_v20 = vld [vmem:[#allocation2 + $0x88] sm:$0xff]  ;;  %v379_v21 = vld [vmem:[#allocation2 + $0x98] sm:$0xff]  ;;  %v2205_v23 = vpack.c.bf16 %v1543_v7, %v1541_v6 }
  0x23   :  { %1617 = vmatprep.subr.bf16.mxu0 %v2131_v34  ;;  %1643 = vmatpush1.bf16.msra.mxu1 %v2167_v56  ;;  %v1542_v26 = vld [vmem:[%s2560_s1 + $0xf0] sm:$0xff]  ;;  %v1545_v27 = vld [vmem:[%s2560_s1 + $0x108] sm:$0xff]  ;;  %v1547_v28 = vld [vmem:[%s2560_s1 + $0x118] sm:$0xff]  ;;  %v2220_v29 = vpack.c.bf16 %v374_v13, %v372_v12  ;;  %v2224_v30 = vpack.c.bf16 %v379_v21, %v377_v20 }
  0x24   :  { %1645 = vmatprep.subr.bf16.mxu1 %v2171_v57  ;;  %v376_v32 = vld [vmem:[#allocation2 + $0x80] sm:$0xff]  ;;  %v378_v33 = vld [vmem:[#allocation2 + $0x90] sm:$0xff]  ;;  %v381_v36 = vld [vmem:[#allocation2 + $0xa8] sm:$0xff]  ;;  %v2231_v38 = vpack.c.bf16 %v1547_v28, %v1545_v27 }
  0x25   :  { %1521 = vmatmul.mubr.msk.f32.gmra.mrb[2].mxu0 %vm55_vm1, %v53_v24  ;;  %v1540_v24 = vld [vmem:[%s2560_s1 + $0xe0] sm:$0xff]  ;;  %v383_v37 = vld [vmem:[#allocation2 + $0xb8] sm:$0xff]  ;;  %v1546_v40 = vld [vmem:[%s2560_s1 + $0x110] sm:$0xff]  ;;  %v2240_v43 = vpack.c.bf16 %v378_v33, %v376_v32 }
  0x26   :  { %1619 = vmatpush1.bf16.msra.mxu0 %v2145_v46  ;;  %237 = vmatprep.mubr.f32.mxu0 %v1991_v0  ;;  %v2227_v35 = vpack.c.bf16 %v1542_v26, %v1540_v24  ;;  %v1544_v39 = vld [vmem:[%s2560_s1 + $0x100] sm:$0xff]  ;;  %v2244_v44 = vpack.c.bf16 %v383_v37, %v381_v36  ;;  %v382_v48 = vld [vmem:[#allocation2 + $0xb0] sm:$0xff]  ;;  %v385_v53 = vld [vmem:[#allocation2 + $0xc8] sm:$0xff] }
  0x27   :  { %1621 = vmatprep.subr.bf16.mxu0 %v2151_v51  ;;  %1647 = vmatpush1.bf16.msra.mxu1 %v2195_v10  ;;  %v380_v45 = vld [vmem:[#allocation2 + $0xa0] sm:$0xff]  ;;  %v1634_v52 = vpack.c.bf16 %v1546_v40, %v1544_v39  ;;  %v387_v54 = vld [vmem:[#allocation2 + $0xd8] sm:$0xff]  ;;  %v386_v19 = vld [vmem:[#allocation2 + $0xd0] sm:$0xff] }
  0x28   :  { %1649 = vmatprep.subr.bf16.mxu1 %v2198_v11  ;;  %v2252_v55 = vpack.c.bf16 %v382_v48, %v380_v45  ;;  %v2255_v58 = vpack.c.bf16 %v387_v54, %v385_v53  ;;  %v384_v18 = vld [vmem:[#allocation2 + $0xc0] sm:$0xff]  ;;  %v393_v5 = vld [vmem:[#allocation2 + $0x108] sm:$0xff]  ;;  %v395_v6 = vld [vmem:[#allocation2 + $0x118] sm:$0xff] }
  0x29   :  { %v2260_v60 = vpack.c.bf16 %v386_v19, %v384_v18  ;;  %v2310_v7 = vpack.c.bf16 %v395_v6, %v393_v5  ;;  %v392_v12 = vld [vmem:[#allocation2 + $0x100] sm:$0xff]  ;;  %v1249_v20 = vld [vmem:[#allocation2 + $0x148] sm:$0xff]  ;;  %v398_v26 = vld [vmem:[#allocation2 + $0x130] sm:$0xff] }
  0x2a   :  { %1623 = vmatpush1.bf16.msra.mxu0 %v2176_v62  ;;  %v396_v24 = vld [vmem:[#allocation2 + $0x120] sm:$0xff]  ;;  %v1250_v33 = vld [vmem:[#allocation2 + $0x150] sm:$0xff]  ;;  %v1253_v36 = vld [vmem:[#allocation2 + $0x168] sm:$0xff] }
  0x2b   :  { %1625 = vmatprep.subr.bf16.mxu0 %v2180_v2  ;;  %1651 = vmatpush1.bf16.msra.mxu1 %v2220_v29  ;;  %v2318_v28 = vpack.c.bf16 %v398_v26, %v396_v24  ;;  %v1248_v32 = vld [vmem:[#allocation2 + $0x140] sm:$0xff]  ;;  %v1255_v37 = vld [vmem:[#allocation2 + $0x178] sm:$0xff]  ;;  %v1254_v40 = vld [vmem:[#allocation2 + $0x170] sm:$0xff] }
  0x2c   :  { %1653 = vmatprep.subr.bf16.mxu1 %v2224_v30  ;;  %v1252_v39 = vld [vmem:[#allocation2 + $0x160] sm:$0xff]  ;;  %v1257_v48 = vld [vmem:[#allocation2 + $0x188] sm:$0xff]  ;;  %v1259_v49 = vld [vmem:[#allocation2 + $0x198] sm:$0xff] }
  0x2d   :  { %1534 = vmatmul.mubr.msk.f32.vlgmr.msra.gmra.mrb[0].mxu0 %vm55_vm1, %v168_v15  ;;  %v397_v15 = vld [vmem:[#allocation2 + $0x128] sm:$0xff]  ;;  %v2328_v45 = vpack.c.bf16 %v1254_v40, %v1252_v39  ;;  %v1258_v53 = vld [vmem:[#allocation2 + $0x190] sm:$0xff]  ;;  %v1263_v19 = vld [vmem:[#allocation2 + $0x1b8] sm:$0xff] }
  0x2e   :  { %1627 = vmatpush1.bf16.msra.mxu0 %v2202_v17  ;;  %243 = vmatprep.mubr.f32.mxu0 %v1991_v0  ;;  %v1261_v18 = vld [vmem:[#allocation2 + $0x1a8] sm:$0xff]  ;;  %v1275_v6 = vld [vmem:[#allocation2 + $0x218] sm:$0xff]  ;;  %v1276_v26 = vld [vmem:[#allocation2 + $0x220] sm:$0xff] }
  0x2f   :  { %1629 = vmatprep.subr.bf16.mxu0 %v2205_v23  ;;  %1655 = vmatpush1.bf16.msra.mxu1 %v2240_v43  ;;  %v1273_v5 = vld [vmem:[#allocation2 + $0x208] sm:$0xff]  ;;  %v1280_v39 = vld [vmem:[#allocation2 + $0x240] sm:$0xff]  ;;  %v1282_v40 = vld [vmem:[#allocation2 + $0x250] sm:$0xff] }
  0x30   :  { %1657 = vmatprep.subr.bf16.mxu1 %v2244_v44 }
  0x31   :  { %1535 = vmatmul.mubr.msk.f32.gmra.mrb[2].mxu0 %vm55_vm1, %v167_v61  ;;  %v1557_v61 = vld [vmem:[%s2559_s0 + $0x10] sm:$0xff] }
  0x32   :  { %1631 = vmatpush1.bf16.msra.mxu0 %v2227_v35  ;;  %339 = vmatprep.mubr.f32.mxu0 %v1991_v0  ;;  %v798_v63 = vrot.slane %v1557_v61, 4 }
  0x33   :  { %1633 = vmatprep.subr.bf16.mxu0 %v2231_v38  ;;  %1659 = vmatpush1.bf16.msra.mxu1 %v2252_v55 }
  0x34   :  { %1661 = vmatprep.subr.bf16.mxu1 %v2255_v58 }
  0x36   :  { %1635 = vmatpush1.bf16.msra.mxu0 %v1634_v52 }
  0x37   :  { %1757 = vmatprep.subr.bf16.mxu0 %v2044_v4  ;;  %v1558_v4 = vld [vmem:[%s2559_s0 + $0x18] sm:$0xff]  ;;  %1663 = vmatpush1.bf16.msra.mxu1 %v2260_v60 }
  0x38   :  { %v799_v1 = vrot.slane %v1558_v4, 4 }
  0x39   :  { %1548 = vmatmul.mubr.msk.f32.vlgmr.msra.gmra.mrb[0].mxu0 %vm55_vm1, %v270_v59  ;;  %v2337_v59 = vpack.c.bf16 %v1263_v19, %v1261_v18  ;;  %v1284_v18 = vld [vmem:[#allocation2 + $0x260] sm:$0xff]  ;;  %v1286_v19 = vld [vmem:[#allocation2 + $0x270] sm:$0xff] }
  0x3a   :  { %1759 = vmatpush1.bf16.msra.mxu0 %v2055_v8  ;;  %345 = vmatprep.mubr.f32.mxu0 %v1991_v0  ;;  %v800_v8 = vsel %vm51_vm0, %v798_v63, %v799_v1 }
  0x3b   :  { %1761 = vmatprep.subr.bf16.mxu0 %v2057_v9  ;;  %v909_v9 = vrot.slane %v1557_v61, 3 }
  0x3d   :  { %1549 = vmatmul.mubr.msk.f32.gmra.mrb[2].mxu0 %vm55_vm1, %v269_v50  ;;  %v2331_v50 = vpack.c.bf16 %v1259_v49, %v1257_v48  ;;  %v2369_v48 = vpack.c.bf16 %v1282_v40, %v1280_v39  ;;  %v1285_v49 = vld [vmem:[#allocation2 + $0x268] sm:$0xff] }
  0x3e   :  { %1763 = vmatpush1.bf16.msra.mxu0 %v2073_v14  ;;  %869 = vmatprep.mubr.f32.mxu0 %v1991_v0  ;;  %v910_v14 = vrot.slane %v1558_v4, 3 }
  0x3f   :  { %1765 = vmatprep.subr.bf16.mxu0 %v2079_v16 }
  0x40   :  { %v911_v16 = vsel %vm165_vm2, %v909_v9, %v910_v14 }
  0x42   :  { %1767 = vmatpush1.bf16.msra.mxu0 %v2101_v22  ;;  %v1009_v22 = vrot.slane %v1557_v61, 2  ;;  %v1260_v61 = vld [vmem:[#allocation2 + $0x1a0] sm:$0xff] }
  0x43   :  { %1769 = vmatprep.subr.bf16.mxu0 %v2106_v25  ;;  %v1010_v25 = vrot.slane %v1558_v4, 2  ;;  %v1262_v4 = vld [vmem:[#allocation2 + $0x1b0] sm:$0xff] }
  0x44   :  { %v2339_v63 = vpack.c.bf16 %v1262_v4, %v1260_v61  ;;  %v2375_v61 = vpack.c.bf16 %v1286_v19, %v1284_v18  ;;  %v1382_v4 = vld [vmem:[#allocation2 + $0x288] sm:$0xff] }
  0x45   :  { %1559 = vmatmul.mubr.msk.f32.vlgmr.msra.gmra.mrb[4].mxu0 %vm55_vm1, %v800_v8  ;;  %v1267_v8 = vld [vmem:[#allocation2 + $0x1d8] sm:$0xff] }
  0x46   :  { %1771 = vmatpush1.bf16.msra.mxu0 %v2122_v31  ;;  %875 = vmatprep.mubr.f32.mxu0 %v1991_v0  ;;  %v1011_v31 = vsel %vm267_vm3, %v1009_v22, %v1010_v25 }
  0x47   :  { %1773 = vmatprep.subr.bf16.mxu0 %v2131_v34  ;;  %v389_v34 = vld [vmem:[#allocation2 + $0xe8] sm:$0xff] }
  0x49   :  { %1560 = vmatmul.mubr.msk.f32.gmra.mrb[6].mxu0 %vm55_vm1, %v799_v1  ;;  %v1265_v1 = vld [vmem:[#allocation2 + $0x1c8] sm:$0xff] }
  0x4a   :  { %1775 = vmatpush1.bf16.msra.mxu0 %v2145_v46  ;;  %980 = vmatprep.mubr.f32.mxu0 %v1991_v0  ;;  %v391_v46 = vld [vmem:[#allocation2 + $0xf8] sm:$0xff]  ;;  %v2343_v9 = vpack.c.bf16 %v1267_v8, %v1265_v1 }
  0x4b   :  { %1777 = vmatprep.subr.bf16.mxu0 %v2151_v51  ;;  %v2304_v51 = vpack.c.bf16 %v391_v46, %v389_v34  ;;  %v1268_v46 = vld [vmem:[#allocation2 + $0x1e0] sm:$0xff]  ;;  %v1384_v1 = vld [vmem:[#allocation2 + $0x298] sm:$0xff] }
  0x4c   :  { %v2379_v8 = vpack.c.bf16 %v1384_v1, %v1382_v4 }
  0x4d   :  { %1665 = vmatprep.subr.bf16.mxu1 %v2304_v51 }
  0x4e   :  { %1779 = vmatpush1.bf16.msra.mxu0 %v2176_v62  ;;  %v388_v62 = vld [vmem:[#allocation2 + $0xe0] sm:$0xff] }
  0x4f   :  { %1781 = vmatprep.subr.bf16.mxu0 %v2180_v2  ;;  %v390_v2 = vld [vmem:[#allocation2 + $0xf0] sm:$0xff] }
  0x50   :  { %v2306_v3 = vpack.c.bf16 %v390_v2, %v388_v62  ;;  %v1270_v62 = vld [vmem:[#allocation2 + $0x1f0] sm:$0xff] }
  0x51   :  { %1573 = vmatmul.mubr.msk.f32.vlgmr.msra.gmra.mrb[4].mxu0 %vm55_vm1, %v911_v16  ;;  %v1266_v16 = vld [vmem:[#allocation2 + $0x1d0] sm:$0xff]  ;;  %v2351_v2 = vpack.c.bf16 %v1270_v62, %v1268_v46 }
  0x52   :  { %1783 = vmatpush1.bf16.msra.mxu0 %v2202_v17  ;;  %986 = vmatprep.mubr.f32.mxu0 %v1991_v0  ;;  %v399_v17 = vld [vmem:[#allocation2 + $0x138] sm:$0xff] }
  0x53   :  { %1785 = vmatprep.subr.bf16.mxu0 %v2205_v23  ;;  %1667 = vmatpush1.bf16.msra.mxu1 %v2306_v3  ;;  %v2316_v21 = vpack.c.bf16 %v399_v17, %v397_v15  ;;  %v1251_v23 = vld [vmem:[#allocation2 + $0x158] sm:$0xff]  ;;  %v1274_v15 = vld [vmem:[#allocation2 + $0x210] sm:$0xff] }
  0x54   :  { %1669 = vmatprep.subr.bf16.mxu1 %v2310_v7  ;;  %v1832_v27 = vpack.c.bf16 %v1251_v23, %v1249_v20  ;;  %v1277_v20 = vld [vmem:[#allocation2 + $0x228] sm:$0xff]  ;;  %v1279_v23 = vld [vmem:[#allocation2 + $0x238] sm:$0xff] }
  0x55   :  { %1574 = vmatmul.mubr.msk.f32.gmra.mrb[6].mxu0 %vm55_vm1, %v910_v14  ;;  %v1264_v14 = vld [vmem:[#allocation2 + $0x1c0] sm:$0xff]  ;;  %v2361_v24 = vpack.c.bf16 %v1279_v23, %v1277_v20 }
  0x56   :  { %1787 = vmatpush1.bf16.msra.mxu0 %v2227_v35  ;;  %1080 = vmatprep.mubr.f32.mxu0 %v1991_v0  ;;  %v2321_v35 = vpack.c.bf16 %v1250_v33, %v1248_v32  ;;  %v2345_v22 = vpack.c.bf16 %v1266_v16, %v1264_v14  ;;  %v1281_v33 = vld [vmem:[#allocation2 + $0x248] sm:$0xff]  ;;  %v138_v14 = vlaneseq }
  0x57   :  { %1789 = vmatprep.subr.bf16.mxu0 %v2231_v38  ;;  %v2325_v38 = vpack.c.bf16 %v1255_v37, %v1253_v36  ;;  %v1283_v36 = vld [vmem:[#allocation2 + $0x258] sm:$0xff] }
  0x58   :  { %v2367_v37 = vpack.c.bf16 %v1283_v36, %v1281_v33  ;;  %v139_v16 = vshrl.u32 %v138_v14, 7 }
  0x5a   :  { %1791 = vmatpush1.bf16.msra.mxu0 %v1634_v52  ;;  %v1256_v52 = vld [vmem:[#allocation2 + $0x180] sm:$0xff]  ;;  %v2387_v46 = vsub.s32 0, %v139_v16 }
  0x5b   :  { %1833 = vmatprep.subr.bf16.mxu0 %v1832_v27  ;;  %v2333_v54 = vpack.c.bf16 %v1258_v53, %v1256_v52  ;;  %v1287_v52 = vld [vmem:[#allocation2 + $0x278] sm:$0xff] }
  0x5c   :  { %v2373_v53 = vpack.c.bf16 %v1287_v52, %v1285_v49 }
  0x5d   :  { %1587 = vmatmul.mubr.msk.f32.vlgmr.msra.gmra.mrb[4].mxu0 %vm55_vm1, %v1011_v31  ;;  %v1271_v31 = vld [vmem:[#allocation2 + $0x1f8] sm:$0xff] }
  0x5e   :  { %1086 = vmatprep.mubr.f32.mxu0 %v1991_v0  ;;  %v394_v0 = vld [vmem:[#allocation2 + $0x110] sm:$0xff]  ;;  %1835 = vmatpush1.bf16.msra.mxu0 %v2321_v35 }
  0x5f   :  { %v2312_v13 = vpack.c.bf16 %v394_v0, %v392_v12  ;;  %1837 = vmatprep.subr.bf16.mxu0 %v2325_v38  ;;  %v2355_v12 = vpack.c.bf16 %v1275_v6, %v1273_v5  ;;  %v1272_v0 = vld [vmem:[#allocation2 + $0x200] sm:$0xff] }
  0x60   :  { %v2357_v17 = vpack.c.bf16 %v1274_v15, %v1272_v0 }
  0x61   :  { %1588 = vmatmul.mubr.msk.f32.gmra.mrb[6].mxu0 %vm55_vm1, %v1010_v25  ;;  %1671 = vmatpush1.bf16.msra.mxu1 %v2312_v13  ;;  %v1269_v25 = vld [vmem:[#allocation2 + $0x1e8] sm:$0xff] }
  0x62   :  { %1673 = vmatprep.subr.bf16.mxu1 %v2316_v21  ;;  %1839 = vmatpush1.bf16.msra.mxu0 %v2328_v45  ;;  %v2349_v34 = vpack.c.bf16 %v1271_v31, %v1269_v25  ;;  %v2382_v25 = vsub.s32 1, %v139_v16  ;;  %v36_v31 = vld [vmem:[%s2561_s2] sm:$0x3] }
  0x63   :  { %1841 = vmatprep.subr.bf16.mxu0 %v2331_v50  ;;  %v141_v0 = vrot.slane %v36_v31, %v2387_v46 }
  0x64   :  { %v145_v5 = vrot.slane %v36_v31, %v2382_v25 }
  0x65   :  { %1675 = vmatpush1.bf16.msra.mxu1 %v2318_v28 }
  0x66   :  { %1677 = vmatprep.subr.bf16.mxu1 %v1832_v27  ;;  %1843 = vmatpush1.bf16.msra.mxu0 %v2333_v54  ;;  %v1278_v27 = vld [vmem:[#allocation2 + $0x230] sm:$0xff] }
  0x67   :  { %1845 = vmatprep.subr.bf16.mxu0 %v2337_v59  ;;  %v2363_v32 = vpack.c.bf16 %v1278_v27, %v1276_v26 }
  0x6a   :  { %1847 = vmatpush1.bf16.msra.mxu0 %v2339_v63 }
  0x6b   :  { %1849 = vmatprep.subr.bf16.mxu0 %v2343_v9 }
  0x6e   :  { %1851 = vmatpush1.bf16.msra.mxu0 %v2345_v22 }
  0x6f   :  { %1853 = vmatprep.subr.bf16.mxu0 %v2349_v34 }
  0x72   :  { %1855 = vmatpush1.bf16.msra.mxu0 %v2351_v2 }
  0x73   :  { %1857 = vmatprep.subr.bf16.mxu0 %v2355_v12 }
  0x76   :  { %1859 = vmatpush1.bf16.msra.mxu0 %v2357_v17 }
  0x77   :  { %1861 = vmatprep.subr.bf16.mxu0 %v2361_v24 }
  0x7a   :  { %1863 = vmatpush1.bf16.msra.mxu0 %v2363_v32 }
  0x7b   :  { %1865 = vmatprep.subr.bf16.mxu0 %v2367_v37 }
  0x7e   :  { %1867 = vmatpush1.bf16.msra.mxu0 %v2369_v48 }
  0x7f   :  { %1869 = vmatprep.subr.bf16.mxu0 %v2373_v53 }
  0x82   :  { %1871 = vmatpush1.bf16.msra.mxu0 %v2375_v61 }
  0x83   :  { %1873 = vmatprep.subr.bf16.mxu0 %v2379_v8 }
 0x10c   :  { %v341_v62 = vpop.f32.mrb[0].mxu0 }
 0x10d   :  { %v343_v6 = vpop.f32.mrb[1].mxu0  ;;  %v2395_v27 = vadd.f32 %v341_v62, %v141_v0 }
 0x10e   :  { %v2391_v20 = vadd.f32 %v343_v6, %v145_v5  ;;  %v1383_v6 = vld [vmem:[#allocation2 + $0x290] sm:$0xff] }
 0x10f   :  { %v404_v18 = vrot.slane %v2395_v27, 2 }
 0x110   :  { %v347_v15 = vpop.f32.mrb[2].mxu0  ;;  %v407_v52 = vrot.slane %v2391_v20, 2  ;;  %v554_v14 = vrot.slane %v2391_v20, 1 }
 0x111   :  { %v2393_v23 = vadd.f32 %v347_v15, %v141_v0  ;;  %v349_v26 = vpop.f32.mrb[3].mxu0 }
 0x112   :  { %v1915_v33 = vadd.f32 %v349_v26, %v145_v5 }
 0x113   :  { %v2399_v36 = vsel %vm356_vm4, %v2393_v23, 0.0 }
 0x114   :  { %v405_v39 = vrot.slane %v2399_v36, 2  ;;  %v2403_v40 = vsel %vm356_vm4, %v1915_v33, 0.0  ;;  %v1386_v33 = vld [vmem:[#allocation2 + $0x2a8] sm:$0xff] }
 0x115   :  { %v408_v49 = vrot.slane %v2403_v40, 2  ;;  %v555_v1 = vrot.slane %v2403_v40, 1 }
 0x116   :  { %v406_v4 = vsel %vm267_vm3, %v404_v18, %v405_v39 }
 0x117   :  { %v409_v19 = vsel %vm267_vm3, %v407_v52, %v408_v49  ;;  %v556_v16 = vsel %vm550_vm6, %v554_v14, %v555_v1 }
 0x118   :  { %1550 = vmatprep.mubr.msk.f32.mxu1 %vm412_vm5, %v409_v19 }
 0x119   :  { %482 = vmatmul.mubr.f32.vlgmr.msra.gmra.mrb[0].mxu1 %v406_v4 }
 0x11a   :  { %1679 = vmatpush1.bf16.msra.mxu1 %v2321_v35  ;;  %1551 = vmatprep.mubr.msk.f32.mxu1 %vm412_vm5, %v408_v49  ;;  %v783_v35 = vld [vmem:[%s2561_s2] sm:$0x3] }
 0x11b   :  { %1681 = vmatprep.subr.bf16.mxu1 %v2325_v38  ;;  %v886_v38 = vrot.slane %v783_v35, %v2387_v46 }
 0x11d   :  { %488 = vmatmul.mubr.f32.gmra.mrb[2].mxu1 %v405_v39 }
 0x11e   :  { %1683 = vmatpush1.bf16.msra.mxu1 %v2328_v45  ;;  %1552 = vmatprep.mubr.msk.f32.mxu1 %vm412_vm5, %v556_v16  ;;  %v890_v45 = vrot.slane %v783_v35, %v2382_v25  ;;  %v1385_v16 = vld [vmem:[#allocation2 + $0x2a0] sm:$0xff]  ;;  %v1387_v35 = vld [vmem:[#allocation2 + $0x2b0] sm:$0xff] }
 0x11f   :  { %1685 = vmatprep.subr.bf16.mxu1 %v2331_v50 }
 0x122   :  { %1687 = vmatpush1.bf16.msra.mxu1 %v2333_v54 }
 0x123   :  { %1689 = vmatprep.subr.bf16.mxu1 %v2337_v59 }
 0x126   :  { %1691 = vmatpush1.bf16.msra.mxu1 %v2339_v63 }
 0x127   :  { %1693 = vmatprep.subr.bf16.mxu1 %v2343_v9 }
 0x12a   :  { %1695 = vmatpush1.bf16.msra.mxu1 %v2345_v22 }
 0x12b   :  { %1697 = vmatprep.subr.bf16.mxu1 %v2349_v34 }
 0x12e   :  { %1699 = vmatpush1.bf16.msra.mxu1 %v2351_v2 }
 0x12f   :  { %1701 = vmatprep.subr.bf16.mxu1 %v2355_v12 }
 0x130   :  { %v1082_v50 = vpop.f32.mrb[4].mxu0 }
 0x131   :  { %v1084_v54 = vpop.f32.mrb[5].mxu0  ;;  %v2436_v59 = vadd.f32 %v1082_v50, %v886_v38  ;;  %v551_v50 = vrot.slane %v2395_v27, 1 }
 0x132   :  { %1703 = vmatpush1.bf16.msra.mxu1 %v2357_v17  ;;  %v1921_v63 = vadd.f32 %v1084_v54, %v890_v45 }
 0x133   :  { %1705 = vmatprep.subr.bf16.mxu1 %v2361_v24  ;;  %v1144_v2 = vrot.slane %v2436_v59, 2  ;;  %v1288_v31 = vrot.slane %v2436_v59, 1  ;;  %v1381_v24 = vld [vmem:[#allocation2 + $0x280] sm:$0xff] }
 0x134   :  { %v1088_v9 = vpop.f32.mrb[6].mxu0  ;;  %v1147_v62 = vrot.slane %v1921_v63, 2  ;;  %v1291_v5 = vrot.slane %v1921_v63, 1 }
 0x135   :  { %v2439_v22 = vadd.f32 %v1088_v9, %v886_v38  ;;  %v1090_v34 = vpop.f32.mrb[7].mxu0  ;;  %v1390_v38 = vld [vmem:[#allocation2 + $0x2c8] sm:$0xff] }
 0x136   :  { %1707 = vmatpush1.bf16.msra.mxu1 %v2363_v32  ;;  %v1923_v12 = vadd.f32 %v1090_v34, %v890_v45  ;;  %v1388_v32 = vld [vmem:[#allocation2 + $0x2b8] sm:$0xff]  ;;  %v1391_v34 = vld [vmem:[#allocation2 + $0x2d0] sm:$0xff] }
 0x137   :  { %v2446_v17 = vsel %vm356_vm4, %v2439_v22, 0.0  ;;  %1709 = vmatprep.subr.bf16.mxu1 %v2367_v37  ;;  %v1874_v37 = vpack.c.bf16 %v1383_v6, %v1381_v24  ;;  %v1876_v4 = vpack.c.bf16 %v1388_v32, %v1386_v33  ;;  %v1392_v45 = vld [vmem:[#allocation2 + $0x2d8] sm:$0xff]  ;;  %v1399_v33 = vld [vmem:[#allocation2 + $0x310] sm:$0xff]  ;;  %v1402_v32 = vld [vmem:[#allocation2 + $0x328] sm:$0xff] }
 0x138   :  { %v1145_v0 = vrot.slane %v2446_v17, 2  ;;  %v1289_v15 = vrot.slane %v2446_v17, 1  ;;  %v2452_v26 = vsel %vm356_vm4, %v1923_v12, 0.0  ;;  %v1880_v9 = vpack.c.bf16 %v1392_v45, %v1390_v38  ;;  %v1393_v12 = vld [vmem:[#allocation2 + $0x2e0] sm:$0xff]  ;;  %v1400_v24 = vld [vmem:[#allocation2 + $0x318] sm:$0xff]  ;;  %v1407_v38 = vld [vmem:[#allocation2 + $0x350] sm:$0xff] }
 0x139   :  { %v1148_v39 = vrot.slane %v2452_v26, 2  ;;  %v1292_v49 = vrot.slane %v2452_v26, 1  ;;  %v1410_v45 = vld [vmem:[#allocation2 + $0x368] sm:$0xff] }
 0x13a   :  { %1711 = vmatpush1.bf16.msra.mxu1 %v2369_v48  ;;  %v1290_v52 = vsel %vm550_vm6, %v1288_v31, %v1289_v15  ;;  %v2461_v18 = vsel %vm267_vm3, %v1144_v2, %v1145_v0  ;;  %v552_v48 = vrot.slane %v2399_v36, 1  ;;  %v1389_v36 = vld [vmem:[#allocation2 + $0x2c0] sm:$0xff]  ;;  %v1394_v2 = vld [vmem:[#allocation2 + $0x2e8] sm:$0xff]  ;;  %v1396_v31 = vld [vmem:[#allocation2 + $0x2f8] sm:$0xff] }
 0x13b   :  { %1713 = vmatprep.subr.bf16.mxu1 %v2373_v53  ;;  %v1293_v19 = vsel %vm550_vm6, %v1291_v5, %v1292_v49  ;;  %v2468_v14 = vsel %vm267_vm3, %v1147_v62, %v1148_v39  ;;  %v1878_v53 = vpack.c.bf16 %v1387_v35, %v1385_v16  ;;  %v1395_v62 = vld [vmem:[#allocation2 + $0x2f0] sm:$0xff]  ;;  %v1398_v5 = vld [vmem:[#allocation2 + $0x308] sm:$0xff]  ;;  %v1405_v35 = vld [vmem:[#allocation2 + $0x340] sm:$0xff] }
 0x13c   :  { %1591 = vmatprep.mubr.msk.f32.mxu0 %vm412_vm5, %v1293_v19  ;;  %v553_v54 = vsel %vm550_vm6, %v551_v50, %v552_v48  ;;  %v1888_v6 = vpack.c.bf16 %v1400_v24, %v1398_v5  ;;  %v1403_v19 = vld [vmem:[#allocation2 + $0x330] sm:$0xff]  ;;  %v1412_v50 = vld [vmem:[#allocation2 + $0x378] sm:$0xff] }
 0x13d   :  { %1365 = vmatmul.mubr.f32.vlgmr.msra.gmra.mrb[8].mxu0 %v1290_v52  ;;  %v1420_v5 = vld [vmem:[#allocation2 + $0x3b8] sm:$0xff] }
 0x13e   :  { %1715 = vmatpush1.bf16.msra.mxu1 %v2375_v61  ;;  %1875 = vmatpush1.bf16.msra.mxu0 %v1874_v37  ;;  %v1882_v61 = vpack.c.bf16 %v1391_v34, %v1389_v36  ;;  %v1411_v36 = vld [vmem:[#allocation2 + $0x370] sm:$0xff]  ;;  %v1414_v34 = vld [vmem:[#allocation2 + $0x388] sm:$0xff] }
 0x13f   :  { %1717 = vmatprep.subr.bf16.mxu1 %v2379_v8  ;;  %1877 = vmatprep.subr.bf16.mxu0 %v1876_v4  ;;  %v1884_v8 = vpack.c.bf16 %v1396_v31, %v1394_v2  ;;  %v1416_v2 = vld [vmem:[#allocation2 + $0x398] sm:$0xff] }
 0x140   :  { %1592 = vmatprep.mubr.msk.f32.mxu0 %vm412_vm5, %v1292_v49  ;;  %v1404_v49 = vld [vmem:[#allocation2 + $0x338] sm:$0xff] }
 0x141   :  { %628 = vmatmul.mubr.f32.vlgmr.msra.gmra.mrb[0].mxu1 %v553_v54  ;;  %1371 = vmatmul.mubr.f32.gmra.mrb[10].mxu0 %v1289_v15  ;;  %v1397_v15 = vld [vmem:[#allocation2 + $0x300] sm:$0xff]  ;;  %v1892_v52 = vpack.c.bf16 %v1404_v49, %v1402_v32  ;;  %v1900_v54 = vpack.c.bf16 %v1412_v50, %v1410_v45 }
 0x142   :  { %1553 = vmatprep.mubr.msk.f32.mxu1 %vm412_vm5, %v555_v1  ;;  %1719 = vmatpush1.bf16.msra.mxu1 %v1874_v37  ;;  %v1886_v1 = vpack.c.bf16 %v1395_v62, %v1393_v12  ;;  %v1401_v37 = vld [vmem:[#allocation2 + $0x320] sm:$0xff]  ;;  %v1415_v12 = vld [vmem:[#allocation2 + $0x390] sm:$0xff]  ;;  %v1418_v62 = vld [vmem:[#allocation2 + $0x3a8] sm:$0xff] }
 0x143   :  { %1879 = vmatpush1.bf16.msra.mxu0 %v1878_v53  ;;  %1721 = vmatprep.subr.bf16.mxu1 %v1876_v4  ;;  %v1406_v4 = vld [vmem:[#allocation2 + $0x348] sm:$0xff] }
 0x144   :  { %1881 = vmatprep.subr.bf16.mxu0 %v1880_v9  ;;  %1593 = vmatprep.mubr.msk.f32.mxu0 %vm412_vm5, %v1921_v63  ;;  %v1890_v63 = vpack.c.bf16 %v1399_v33, %v1397_v15  ;;  %v1419_v15 = vld [vmem:[#allocation2 + $0x3b0] sm:$0xff] }
 0x145   :  { %634 = vmatmul.mubr.f32.gmra.mrb[2].mxu1 %v552_v48  ;;  %v1408_v48 = vld [vmem:[#allocation2 + $0x358] sm:$0xff] }
 0x146   :  { %1723 = vmatpush1.bf16.msra.mxu1 %v1878_v53  ;;  %1554 = vmatprep.mubr.msk.f32.mxu1 %vm412_vm5, %v2391_v20  ;;  %v1894_v20 = vpack.c.bf16 %v1403_v19, %v1401_v37  ;;  %v1896_v16 = vpack.c.bf16 %v1408_v48, %v1406_v4  ;;  %v1898_v53 = vpack.c.bf16 %v1407_v38, %v1405_v35 }
 0x147   :  { %1883 = vmatpush1.bf16.msra.mxu0 %v1882_v61  ;;  %1725 = vmatprep.subr.bf16.mxu1 %v1880_v9  ;;  %v1409_v9 = vld [vmem:[#allocation2 + $0x360] sm:$0xff] }
 0x148   :  { %1885 = vmatprep.subr.bf16.mxu0 %v1884_v8  ;;  %v1902_v31 = vpack.c.bf16 %v1411_v36, %v1409_v9 }
 0x14a   :  { %1727 = vmatpush1.bf16.msra.mxu1 %v1882_v61  ;;  %v1904_v61 = vpack.c.bf16 %v1416_v2, %v1414_v34 }
 0x14b   :  { %1887 = vmatpush1.bf16.msra.mxu0 %v1886_v1  ;;  %1729 = vmatprep.subr.bf16.mxu1 %v1884_v8  ;;  %v1413_v8 = vld [vmem:[#allocation2 + $0x380] sm:$0xff] }
 0x14c   :  { %1889 = vmatprep.subr.bf16.mxu0 %v1888_v6  ;;  %v1906_v24 = vpack.c.bf16 %v1415_v12, %v1413_v8 }
 0x14e   :  { %1731 = vmatpush1.bf16.msra.mxu1 %v1886_v1  ;;  %v1908_v1 = vpack.c.bf16 %v1420_v5, %v1418_v62 }
 0x14f   :  { %1891 = vmatpush1.bf16.msra.mxu0 %v1890_v63  ;;  %1733 = vmatprep.subr.bf16.mxu1 %v1888_v6  ;;  %v1417_v6 = vld [vmem:[#allocation2 + $0x3a0] sm:$0xff] }
 0x150   :  { %1893 = vmatprep.subr.bf16.mxu0 %v1892_v52  ;;  %v1910_v33 = vpack.c.bf16 %v1419_v15, %v1417_v6 }
 0x152   :  { %1735 = vmatpush1.bf16.msra.mxu1 %v1890_v63 }
 0x153   :  { %1895 = vmatpush1.bf16.msra.mxu0 %v1894_v20  ;;  %1737 = vmatprep.subr.bf16.mxu1 %v1892_v52 }
 0x154   :  { %1897 = vmatprep.subr.bf16.mxu0 %v1896_v16 }
 0x156   :  { %1739 = vmatpush1.bf16.msra.mxu1 %v1894_v20 }
 0x157   :  { %1899 = vmatpush1.bf16.msra.mxu0 %v1898_v53  ;;  %1741 = vmatprep.subr.bf16.mxu1 %v1896_v16 }
 0x158   :  { %1901 = vmatprep.subr.bf16.mxu0 %v1900_v54 }
 0x15a   :  { %1743 = vmatpush1.bf16.msra.mxu1 %v1898_v53 }
 0x15b   :  { %1903 = vmatpush1.bf16.msra.mxu0 %v1902_v31  ;;  %1745 = vmatprep.subr.bf16.mxu1 %v1900_v54 }
 0x15c   :  { %1905 = vmatprep.subr.bf16.mxu0 %v1904_v61 }
 0x15e   :  { %1747 = vmatpush1.bf16.msra.mxu1 %v1902_v31 }
 0x15f   :  { %1907 = vmatpush1.bf16.msra.mxu0 %v1906_v24  ;;  %1749 = vmatprep.subr.bf16.mxu1 %v1904_v61 }
 0x160   :  { %1909 = vmatprep.subr.bf16.mxu0 %v1908_v1 }
 0x162   :  { %1751 = vmatpush1.bf16.msra.mxu1 %v1906_v24 }
 0x163   :  { %1911 = vmatpush1.bf16.msra.mxu0 %v1910_v33  ;;  %1753 = vmatprep.subr.bf16.mxu1 %v1908_v1 }
 0x166   :  { %1490 = vmatmul.mubr.f32.vlgmr.msra.gmra.mrb[8].mxu0 %v2436_v59  ;;  %1755 = vmatpush1.bf16.msra.mxu1 %v1910_v33 }
 0x167   :  { %1594 = vmatprep.mubr.msk.f32.mxu0 %vm412_vm5, %v2452_v26  ;;  %1793 = vmatprep.subr.bf16.mxu1 %v2140_v41  ;;  %v359_v41 = vld [vmem:[%s2563_s4] sm:$0x3] }
 0x169   :  { %754 = vmatmul.mubr.f32.vlgmr.msra.gmra.mrb[0].mxu1 %v2395_v27 }
 0x16a   :  { %1595 = vmatmul.mubr.msk.f32.gmra.mrb[10].mxu0 %vm356_vm4, %v2439_v22  ;;  %1555 = vmatprep.mubr.msk.f32.mxu1 %vm412_vm5, %v2403_v40 }
 0x16b   :  { %1795 = vmatpush1.bf16.msra.mxu1 %v2142_v42 }
 0x16c   :  { %1797 = vmatprep.subr.bf16.mxu1 %v2148_v47  ;;  %v498_v47 = vrot.slane %v359_v41, %v2387_v46 }
 0x16d   :  { %1556 = vmatmul.mubr.msk.f32.gmra.mrb[2].mxu1 %vm356_vm4, %v2393_v23 }
 0x16e   :  { %1589 = vmatprep.mubr.msk.f32.mxu1 %vm412_vm5, %v2468_v14 }
 0x16f   :  { %1799 = vmatpush1.bf16.msra.mxu1 %v2167_v56 }
 0x170   :  { %1801 = vmatprep.subr.bf16.mxu1 %v2171_v57  ;;  %v502_v57 = vrot.slane %v359_v41, %v2382_v25 }
 0x173   :  { %1803 = vmatpush1.bf16.msra.mxu1 %v2195_v10 }
 0x174   :  { %1805 = vmatprep.subr.bf16.mxu1 %v2198_v11 }
 0x177   :  { %1807 = vmatpush1.bf16.msra.mxu1 %v2220_v29 }
 0x178   :  { %1809 = vmatprep.subr.bf16.mxu1 %v2224_v30 }
 0x17b   :  { %1811 = vmatpush1.bf16.msra.mxu1 %v2240_v43 }
 0x17c   :  { %1813 = vmatprep.subr.bf16.mxu1 %v2244_v44 }
 0x17f   :  { %1815 = vmatpush1.bf16.msra.mxu1 %v2252_v55 }
 0x180   :  { %1817 = vmatprep.subr.bf16.mxu1 %v2255_v58 }
 0x183   :  { %1819 = vmatpush1.bf16.msra.mxu1 %v2260_v60 }
 0x184   :  { %1821 = vmatprep.subr.bf16.mxu1 %v2304_v51 }
 0x187   :  { %1823 = vmatpush1.bf16.msra.mxu1 %v2306_v3 }
 0x188   :  { %1825 = vmatprep.subr.bf16.mxu1 %v2310_v7 }
 0x18b   :  { %1827 = vmatpush1.bf16.msra.mxu1 %v2312_v13 }
 0x18c   :  { %1829 = vmatprep.subr.bf16.mxu1 %v2316_v21 }
 0x18f   :  { %1831 = vmatpush1.bf16.msra.mxu1 %v2318_v28  ;;  %v1099_v28 = vld [vmem:[%s2563_s4] sm:$0x3] }
 0x190   :  { %v1237_v23 = vrot.slane %v1099_v28, %v2387_v46  ;;  %v1241_v27 = vrot.slane %v1099_v28, %v2382_v25 }
 0x192   :  { %1221 = vmatmul.mubr.f32.vlgmr.msra.gmra.mrb[4].mxu1 %v2461_v18 }
 0x193   :  { %1590 = vmatprep.mubr.msk.f32.mxu1 %vm412_vm5, %v1148_v39 }
 0x196   :  { %1227 = vmatmul.mubr.f32.gmra.mrb[6].mxu1 %v1145_v0 }
 0x239   :  { %v1491_v42 = vpop.f32.mrb[8].mxu0 }
 0x23a   :  { %v1493_v56 = vpop.f32.mrb[9].mxu0 }
 0x23c   :  { %v755_v10 = vpop.f32.mrb[0].mxu1 }
 0x23d   :  { %v1916_v11 = vadd.f32 %v755_v10, %v498_v47  ;;  %v1497_v29 = vpop.f32.mrb[10].mxu0  ;;  %v757_v30 = vpop.f32.mrb[1].mxu1 }
 0x23e   :  { %v1917_v43 = vadd.f32 %v757_v30, %v502_v57  ;;  %v1499_v44 = vpop.f32.mrb[11].mxu0 }
 0x23f   :  { %v770_v55 = vmax.f32 %v1916_v11, 0.0 }
 0x240   :  { %v771_v58 = vmax.f32 %v1917_v43, 0.0  ;;  %v761_v60 = vpop.f32.mrb[2].mxu1 }
 0x241   :  { %774 = vst [vmem:[%s2564_s5] sm:$0xff] %v770_v55  ;;  %v1918_v51 = vadd.f32 %v761_v60, %v498_v47  ;;  %v763_v3 = vpop.f32.mrb[3].mxu1 }
 0x242   :  { %776 = vst.msk [vmem:[%s2564_s5 + $0x8] sm:$0xff] %vm775_vm7, %v771_v58  ;;  %v1919_v7 = vadd.f32 %v763_v3, %v502_v57 }
 0x243   :  { %v772_v13 = vmax.f32 %v1918_v51, 0.0 }
 0x244   :  { %v773_v21 = vmax.f32 %v1919_v7, 0.0 }
 0x245   :  { %777 = vst [vmem:[%s2564_s5 + $0x10] sm:$0x1] %v772_v13 }
 0x246   :  { %779 = vst.msk [vmem:[%s2564_s5 + $0x18] sm:$0x1] %vm778_vm8, %v773_v21 }
 0x265   :  { %v1222_v40 = vpop.f32.mrb[4].mxu1 }
 0x266   :  { %v1244_v59 = vadd.f32 %v1237_v23, %v1222_v40  ;;  %v1224_v22 = vpop.f32.mrb[5].mxu1 }
 0x267   :  { %v1245_v17 = vadd.f32 %v1241_v27, %v1224_v22 }
 0x268   :  { %v1925_v0 = vadd.f32 %v1491_v42, %v1244_v59 }
 0x269   :  { %v1927_v26 = vadd.f32 %v1493_v56, %v1245_v17  ;;  %v1228_v39 = vpop.f32.mrb[6].mxu1 }
 0x26a   :  { %v1506_v18 = vmax.f32 %v1925_v0, 0.0  ;;  %v1246_v14 = vadd.f32 %v1237_v23, %v1228_v39  ;;  %v1230_v32 = vpop.f32.mrb[7].mxu1 }
 0x26b   :  { %v1507_v49 = vmax.f32 %v1927_v26, 0.0  ;;  %v1247_v63 = vadd.f32 %v1241_v27, %v1230_v32 }
 0x26c   :  { %1596 = vst [vmem:[%s2564_s5 + $0x20] sm:$0xff] %v1506_v18  ;;  %v1929_v52 = vadd.f32 %v1497_v29, %v1246_v14 }
 0x26d   :  { %1597 = vst.msk [vmem:[%s2564_s5 + $0x28] sm:$0xff] %vm775_vm7, %v1507_v49  ;;  %v1931_v25 = vadd.f32 %v1499_v44, %v1247_v63 }
 0x26e   :  { %v1508_v46 = vmax.f32 %v1929_v52, 0.0 }
 0x26f   :  { %v1509_v37 = vmax.f32 %v1931_v25, 0.0 }
 0x270   :  { %1598 = vst [vmem:[%s2564_s5 + $0x30] sm:$0x1] %v1508_v46 }
 0x271   :  { %1599 = vst.msk [vmem:[%s2564_s5 + $0x38] sm:$0x1] %vm778_vm8, %v1509_v37 }
 0x272   :  { %1519 = vsyncpa [#allocation3], 1 }

</bundles_post_ra>
